<compile_context>
chip_gen: v5e
topology: v5e:2x2
jax: 0.10.0
libtpu: 0.0.40
codegen_flags: <defaults>
</compile_context>

<pallas_src>
import functools

import jax
import jax.numpy as jnp
from jax.experimental import pallas as pl
from jax.experimental.pallas import tpu as pltpu


def _round_up(x, m):
    return ((x + m - 1) // m) * m


def _vmem_limit_bytes():
    """Scoped-VMEM budget, re-derived per chip generation.

    v7x has 64 MiB physical VMEM per TensorCore; v5e/v6e have 128 MiB.
    The scoped default (16-32 MiB) is raised but kept well inside physical.
    """
    try:
        cap = pltpu.get_tpu_info().vmem_capacity_bytes
    except Exception:  # query unavailable -> conservative fallback
        cap = 64 << 20
    return int(min(cap * 3 // 4, 48 << 20))


# --------------------------------------------------------------------------
# Pass 1: online per-head softmax stats + per-column extrema of the
#          un-normalized expand_output (w = (p * feat) @ W_exp, no bias).
# --------------------------------------------------------------------------
def _stats_kernel(inc_ref, t_ext_ref, b_att_ref, expand_h_ref, w_exp_ref,
                  expand_e_ref,
                  smax_ref, ssum_ref, cmin_ref, cmax_ref,
                  *, num_edges, hh, tile_e, compute_dtype):
    i = pl.program_id(0)

    @pl.when(i == 0)
    def _init():
        smax_ref[...] = jnp.full(smax_ref.shape, -jnp.inf, smax_ref.dtype)
        ssum_ref[...] = jnp.zeros(ssum_ref.shape, ssum_ref.dtype)
        cmin_ref[...] = jnp.full(cmin_ref.shape, jnp.inf, cmin_ref.dtype)
        cmax_ref[...] = jnp.full(cmax_ref.shape, -jnp.inf, cmax_ref.dtype)

    # One wide incidence matmul gives both masked node features and scores.
    me = jnp.dot(inc_ref[...], t_ext_ref[...],
                 preferred_element_type=jnp.float32)          # (T, HH+H)
    feat = me[:, :hh]                                         # (T, HH)
    s = me[:, hh:] + b_att_ref[...]                           # (T, H)
    s = jnp.where(s >= 0, s, 0.2 * s)                         # LeakyReLU(0.2)

    # Mask rows past the true edge count (E was padded to a tile multiple).
    row = i * tile_e + jax.lax.broadcasted_iota(jnp.int32, (tile_e, 1), 0)
    valid = row < num_edges
    s = jnp.where(valid, s, -jnp.inf)

    # ---- online softmax statistics (flash-attention style) ----
    m_old = smax_ref[...]
    m_new = jnp.maximum(m_old, jnp.max(s, axis=0, keepdims=True))
    alpha = jnp.exp(m_old - m_new)                            # first tile: 0
    p = jnp.exp(s - m_new)                                    # invalid rows: 0
    ssum_ref[...] = alpha * ssum_ref[...] + jnp.sum(p, axis=0, keepdims=True)
    smax_ref[...] = m_new

    # ---- un-normalized expand_output (denominator & bias applied later) ----
    p_cols = jnp.dot(p.astype(compute_dtype), expand_h_ref[...],
                     preferred_element_type=jnp.float32)      # (T, HH)
    w = jnp.dot((p_cols * feat).astype(compute_dtype), w_exp_ref[...],
                preferred_element_type=jnp.float32)           # (T, HE)

    tile_min = jnp.min(jnp.where(valid, w, jnp.inf), axis=0, keepdims=True)
    tile_max = jnp.max(jnp.where(valid, w, -jnp.inf), axis=0, keepdims=True)

    # Rescale previously accumulated extrema to the new per-head max reference
    # (positive scale preserves per-column min/max ordering).
    alpha_cols = jnp.dot(alpha, expand_e_ref[...],
                         preferred_element_type=jnp.float32)  # (1, HE)
    is_first = i == 0
    cmin_ref[...] = jnp.where(is_first, tile_min,
                              jnp.minimum(alpha_cols * cmin_ref[...], tile_min))
    cmax_ref[...] = jnp.where(is_first, tile_max,
                              jnp.maximum(alpha_cols * cmax_ref[...], tile_max))


# --------------------------------------------------------------------------
# Pass 2: recompute each tile, apply softmax + per-head min-max normalize,
#          ReLU and the final output transform.  Tiles are independent.
# --------------------------------------------------------------------------
def _output_kernel(inc_ref, t_ext_ref, b_att_ref, expand_h_ref, w_exp_ref,
                   b_exp_ref, w_out_ref, b_out_ref,
                   smax_ref, invd_ref, lane_min_ref, lane_irng_ref,
                   out_ref, *, hh, compute_dtype):
    me = jnp.dot(inc_ref[...], t_ext_ref[...],
                 preferred_element_type=jnp.float32)          # (T, HH+H)
    feat = me[:, :hh]
    s = me[:, hh:] + b_att_ref[...]
    s = jnp.where(s >= 0, s, 0.2 * s)                         # LeakyReLU(0.2)

    # softmax coefficients with precomputed (exact) per-head max and 1/D
    c = jnp.exp(s - smax_ref[...]) * invd_ref[...]            # (T, H)

    c_cols = jnp.dot(c.astype(compute_dtype), expand_h_ref[...],
                     preferred_element_type=jnp.float32)      # (T, HH)
    wef = c_cols * feat
    u = jnp.dot(wef.astype(compute_dtype), w_exp_ref[...],
                preferred_element_type=jnp.float32) + b_exp_ref[...]   # (T, HE)

    # per-head global min-max normalize (stats from pass 1), then ReLU
    u = (u - lane_min_ref[...]) * lane_irng_ref[...]
    u = jnp.maximum(u, 0.0)

    out_ref[...] = (jnp.dot(u.astype(compute_dtype), w_out_ref[...],
                            preferred_element_type=jnp.float32)
                    + b_out_ref[...])


def multi_head_node_to_edge_attention(node_features, incidence_matrix, params,
                                      *, compute_dtype=jnp.bfloat16,
                                      tile_e=512):
    f32 = jnp.float32
    n, _ = node_features.shape
    _, E = incidence_matrix.shape
    H, _, hidden = params["w_nt"].shape
    edge_dim = params["w_exp"].shape[2]
    out_dim = params["w_out_h"].shape[2]
    HH = H * hidden
    HE = H * edge_dim

    # ---- E tiling (sublane-friendly: multiple of 16 works for f32 & bf16) ----
    tile_e = max(16, min(_round_up(tile_e, 16), _round_up(E, 16)))
    E_pad = _round_up(E, tile_e)
    n_tiles = E_pad // tile_e

    # ---- one-time operand packing (precomputed once in production) ----
    x = node_features.astype(f32)
    incT = incidence_matrix.T.astype(compute_dtype)            # (E, n) 0/1 exact
    incT = jnp.pad(incT, ((0, E_pad - E), (0, 0)))             # zero rows past E

    w_nt_all = jnp.concatenate([params["w_nt"][h] for h in range(H)], axis=1)
    b_nt_all = jnp.concatenate([params["b_nt"][h] for h in range(H)], axis=1)
    w_att_blk = jnp.zeros((HH, H), f32)
    for h in range(H):
        w_att_blk = w_att_blk.at[h * hidden:(h + 1) * hidden, h:h + 1].set(
            params["w_att"][h])
    b_att_row = jnp.concatenate([params["b_att"][h] for h in range(H)], axis=1)

    # node transform + fused per-head score columns -> one wide matmul operand
    t = x @ w_nt_all + b_nt_all                                # (n, HH), f32
    t_ext = jnp.concatenate([t, t @ w_att_blk], axis=1).astype(compute_dtype)

    expand_h = jnp.zeros((H, HH), f32)      # head coeff -> hidden lanes
    expand_e = jnp.zeros((H, HE), f32)      # head scalar -> edge_dim lanes
    for h in range(H):
        expand_h = expand_h.at[h, h * hidden:(h + 1) * hidden].set(1.0)
        expand_e = expand_e.at[h, h * edge_dim:(h + 1) * edge_dim].set(1.0)
    expand_h_c = expand_h.astype(compute_dtype)

    w_exp_blk = jnp.zeros((HH, HE), f32)                        # block diagonal
    for h in range(H):
        w_exp_blk = w_exp_blk.at[h * hidden:(h + 1) * hidden,
                                 h * edge_dim:(h + 1) * edge_dim].set(
            params["w_exp"][h])
    w_exp_blk = w_exp_blk.astype(compute_dtype)
    b_exp_all = jnp.concatenate([params["b_exp"][h] for h in range(H)], axis=1)

    w_out = jnp.concatenate([params["w_out_h"][h] for h in range(H)],
                            axis=0).astype(compute_dtype)       # (HE, out_dim)
    b_out = params["b_out"].astype(f32)                          # (1, out_dim)

    vmem_limit = _vmem_limit_bytes()

    def const(shape):
        # TODO(synk): pipeline_mode=pl.Buffered(1) would single-buffer these
        # constant blocks and reclaim a little VMEM for larger E tiles.
        return pl.BlockSpec(shape, lambda i: (0, 0))

    inc_spec = pl.BlockSpec((tile_e, n), lambda i: (i, 0))

    # -------------------- pass 1: statistics --------------------
    stats_kernel = functools.partial(_stats_kernel, num_edges=E, hh=HH,
                                     tile_e=tile_e, compute_dtype=compute_dtype)
    smax, ssum, cmin, cmax = pl.pallas_call(
        stats_kernel,
        out_shape=(jax.ShapeDtypeStruct((1, H), f32),
                   jax.ShapeDtypeStruct((1, H), f32),
                   jax.ShapeDtypeStruct((1, HE), f32),
                   jax.ShapeDtypeStruct((1, HE), f32)),
        grid_spec=pltpu.PrefetchScalarGridSpec(
            num_scalar_prefetch=0,
            grid=(n_tiles,),
            in_specs=[inc_spec,
                      const((n, HH + H)),
                      const((1, H)),
                      const((H, HH)),
                      const((HH, HE)),
                      const((H, HE))],
            out_specs=(const((1, H)), const((1, H)),
                       const((1, HE)), const((1, HE)))),
        compiler_params=pltpu.CompilerParams(
            dimension_semantics=("arbitrary",),      # sequential accumulation
            vmem_limit_bytes=vmem_limit),
    )(incT, t_ext, b_att_row, expand_h_c, w_exp_blk, expand_e)

    # ---- tiny exact-f32 finalization of the per-head statistics ----
    inv_d = 1.0 / ssum                                           # (1, H)
    inv_d_cols = jnp.repeat(inv_d, edge_dim, axis=1)             # (1, HE)
    u_cmin = cmin * inv_d_cols + b_exp_all
    u_cmax = cmax * inv_d_cols + b_exp_all
    u_min_h = jnp.min(u_cmin.reshape(H, edge_dim), axis=1)       # (H,)
    u_max_h = jnp.max(u_cmax.reshape(H, edge_dim), axis=1)
    rng_h = u_max_h - u_min_h
    # NOTE: reference produces NaN/Inf when a head is constant (max == min);
    # we map that degenerate case to an all-zero head instead.
    rng_h = jnp.where(rng_h == 0.0, 1.0, rng_h)
    lane_min = jnp.repeat(u_min_h, edge_dim)[None, :]            # (1, HE)
    lane_irng = jnp.repeat(1.0 / rng_h, edge_dim)[None, :]       # (1, HE)

    # -------------------- pass 2: normalized output --------------------
    out_kernel = functools.partial(_output_kernel, hh=HH,
                                   compute_dtype=compute_dtype)
    out = pl.pallas_call(
        out_kernel,
        out_shape=jax.ShapeDtypeStruct((E_pad, out_dim), f32),
        grid_spec=pltpu.PrefetchScalarGridSpec(
            num_scalar_prefetch=0,
            grid=(n_tiles,),
            in_specs=[inc_spec,
                      const((n, HH + H)),
                      const((1, H)),
                      const((H, HH)),
                      const((HH, HE)),
                      const((1, HE)),
                      const((HE, out_dim)),
                      const((1, out_dim)),
                      const((1, H)),
                      const((1, H)),
                      const((1, HE)),
                      const((1, HE))],
            out_specs=pl.BlockSpec((tile_e, out_dim), lambda i: (i, 0))),
        compiler_params=pltpu.CompilerParams(
            dimension_semantics=("parallel",),   # independent tiles (v7x 2 TCs)
            vmem_limit_bytes=vmem_limit),
    )(incT, t_ext, b_att_row, expand_h_c, w_exp_blk, b_exp_all, w_out, b_out,
      smax, inv_d, lane_min, lane_irng)

    return out[:E]


def reference_forward(x, inc, p):
    """Pure-JAX reference matching the PyTorch forward (eval mode)."""
    H = p["w_nt"].shape[0]
    heads = []
    for h in range(H):
        t = x @ p["w_nt"][h] + p["b_nt"][h]
        m = inc.T @ t
        s = m @ p["w_att"][h] + p["b_att"][h]
        s = jnp.where(s >= 0, s, 0.2 * s)
        c = jax.nn.softmax(s, axis=0)
        u = (c * m) @ p["w_exp"][h] + p["b_exp"][h]
        u = (u - u.min()) / (u.max() - u.min())
        heads.append(u)
    cat = jnp.maximum(jnp.concatenate(heads, axis=-1), 0.0)
    w_out = jnp.concatenate([p["w_out_h"][h] for h in range(H)], axis=0)
    return cat @ w_out + p["b_out"]


def make_params(key, node_dim, edge_dim, hidden_dim, output_dim, num_heads):
    ks = jax.random.split(key, 8)
    f = jnp.float32
    return {
        "w_nt": 0.1 * jax.random.normal(ks[0], (num_heads, node_dim, hidden_dim), f),
        "b_nt": 0.1 * jax.random.normal(ks[1], (num_heads, 1, hidden_dim), f),
        "w_att": 0.1 * jax.random.normal(ks[2], (num_heads, hidden_dim, 1), f),
        "b_att": 0.1 * jax.random.normal(ks[3], (num_heads, 1, 1), f),
        "w_exp": 0.1 * jax.random.normal(ks[4], (num_heads, hidden_dim, edge_dim), f),
        "b_exp": 0.1 * jax.random.normal(ks[5], (num_heads, 1, edge_dim), f),
        # output_transform weight (num_heads*edge_dim, output_dim) stored per head
        "w_out_h": 0.1 * jax.random.normal(ks[6], (num_heads, edge_dim, output_dim), f),
        "b_out": 0.1 * jax.random.normal(ks[7], (1, output_dim), f),
    }


if __name__ == "__main__":
    key = jax.random.PRNGKey(0)
    n, node_dim, edge_dim, hidden_dim, output_dim, num_heads = 16, 32, 16, 32, 32, 4
    num_edges = 24

    k1, k2, k3 = jax.random.split(key, 3)
    node_features = jax.random.normal(k1, (n, node_dim), jnp.float32)
    incidence = (jax.random.uniform(k2, (n, num_edges)) > 0.5).astype(jnp.float32)
    params = make_params(k3, node_dim, edge_dim, hidden_dim, output_dim, num_heads)

    ref = reference_forward(node_features, incidence, params)

    # f32 path, multi-tile grid (E=24 padded to 32 -> two 16-row tiles):
    # exercises the two-pass online stats, row masking and the parallel pass.
    out_f32 = multi_head_node_to_edge_attention(
        node_features, incidence, params, compute_dtype=jnp.float32, tile_e=16)
    out_f32 = jax.block_until_ready(out_f32)
    assert out_f32.shape == (num_edges, output_dim)
    assert jnp.allclose(out_f32, ref, atol=1e-3, rtol=1e-3), "f32 kernel mismatch"

    # f32 path, single-tile grid (default tile clamps to E): covers the
    # first/only-tile initialization path.
    out_one = multi_head_node_to_edge_attention(
        node_features, incidence, params, compute_dtype=jnp.float32)
    out_one = jax.block_until_ready(out_one)
    assert jnp.allclose(out_one, ref, atol=1e-3, rtol=1e-3), "single-tile mismatch"

    # default bf16-MXU path (looser tolerance for bf16 operand rounding)
    out_bf16 = multi_head_node_to_edge_attention(
        node_features, incidence, params, tile_e=16)
    out_bf16 = jax.block_until_ready(out_bf16)
    assert out_bf16.shape == (num_edges, output_dim)
    assert jnp.allclose(out_bf16, ref, atol=6e-2, rtol=6e-2), "bf16 kernel mismatch"

    print("KERNEL_OK")
</pallas_src>

<mosaic_0001>
module attributes {stable_mosaic.version = 11 : i64} {
  func.func @_stats_kernel(%arg0: i32, %arg1: memref<16x16xf32, #tpu.memory_space<vmem>>, %arg2: memref<16x132xf32, #tpu.memory_space<vmem>>, %arg3: memref<1x4xf32, #tpu.memory_space<vmem>>, %arg4: memref<4x128xf32, #tpu.memory_space<vmem>>, %arg5: memref<128x64xf32, #tpu.memory_space<vmem>>, %arg6: memref<4x64xf32, #tpu.memory_space<vmem>>, %arg7: memref<1x4xf32, #tpu.memory_space<vmem>>, %arg8: memref<1x4xf32, #tpu.memory_space<vmem>>, %arg9: memref<1x64xf32, #tpu.memory_space<vmem>>, %arg10: memref<1x64xf32, #tpu.memory_space<vmem>>) attributes {dimension_semantics = [#tpu.dimension_semantics<arbitrary>], iteration_bounds = array<i64: 2>, scalar_prefetch = 0 : i64, scratch_operands = 0 : i64, tpu.core_type = #tpu.core_type<tc>, window_params = [{transform_indices = @transform_0, window_bounds = array<i64: 16, 16>}, {pipeline_mode = #tpu.pipeline_mode<synchronous>, transform_indices = @transform_1, window_bounds = array<i64: 16, 132>}, {pipeline_mode = #tpu.pipeline_mode<synchronous>, transform_indices = @transform_2, window_bounds = array<i64: 1, 4>}, {pipeline_mode = #tpu.pipeline_mode<synchronous>, transform_indices = @transform_3, window_bounds = array<i64: 4, 128>}, {pipeline_mode = #tpu.pipeline_mode<synchronous>, transform_indices = @transform_4, window_bounds = array<i64: 128, 64>}, {pipeline_mode = #tpu.pipeline_mode<synchronous>, transform_indices = @transform_5, window_bounds = array<i64: 4, 64>}, {pipeline_mode = #tpu.pipeline_mode<synchronous>, transform_indices = @transform_6, window_bounds = array<i64: 1, 4>}, {pipeline_mode = #tpu.pipeline_mode<synchronous>, transform_indices = @transform_7, window_bounds = array<i64: 1, 4>}, {pipeline_mode = #tpu.pipeline_mode<synchronous>, transform_indices = @transform_8, window_bounds = array<i64: 1, 64>}, {pipeline_mode = #tpu.pipeline_mode<synchronous>, transform_indices = @transform_9, window_bounds = array<i64: 1, 64>}]} {
    %c0_i32 = arith.constant 0 : i32
    %0 = arith.cmpi eq, %arg0, %c0_i32 : i32
    %1 = arith.extui %0 : i1 to i32
    %c0_i32_0 = arith.constant 0 : i32
    %2 = arith.cmpi ne, %1, %c0_i32_0 : i32
    scf.if %2 {
      %cst_41 = arith.constant 0xFF800000 : f32
      %72 = vector.broadcast %cst_41 : f32 to vector<1x4xf32>
      %c0_42 = arith.constant 0 : index
      %c0_43 = arith.constant 0 : index
      %73 = vector.load %arg7[%c0_42, %c0_43] : memref<1x4xf32, #tpu.memory_space<vmem>>, vector<1x4xf32>
      tpu.vector_store %arg7[%c0_42, %c0_43], %72 {strides = array<i32>} : memref<1x4xf32, #tpu.memory_space<vmem>>, vector<1x4xf32>,
      %cst_44 = arith.constant 0.000000e+00 : f32
      %74 = vector.broadcast %cst_44 : f32 to vector<1x4xf32>
      %c0_45 = arith.constant 0 : index
      %c0_46 = arith.constant 0 : index
      %75 = vector.load %arg8[%c0_45, %c0_46] : memref<1x4xf32, #tpu.memory_space<vmem>>, vector<1x4xf32>
      tpu.vector_store %arg8[%c0_45, %c0_46], %74 {strides = array<i32>} : memref<1x4xf32, #tpu.memory_space<vmem>>, vector<1x4xf32>,
      %cst_47 = arith.constant 0x7F800000 : f32
      %76 = vector.broadcast %cst_47 : f32 to vector<1x64xf32>
      %c0_48 = arith.constant 0 : index
      %c0_49 = arith.constant 0 : index
      %77 = vector.load %arg9[%c0_48, %c0_49] : memref<1x64xf32, #tpu.memory_space<vmem>>, vector<1x64xf32>
      tpu.vector_store %arg9[%c0_48, %c0_49], %76 {strides = array<i32>} : memref<1x64xf32, #tpu.memory_space<vmem>>, vector<1x64xf32>,
      %cst_50 = arith.constant 0xFF800000 : f32
      %78 = vector.broadcast %cst_50 : f32 to vector<1x64xf32>
      %c0_51 = arith.constant 0 : index
      %c0_52 = arith.constant 0 : index
      %79 = vector.load %arg10[%c0_51, %c0_52] : memref<1x64xf32, #tpu.memory_space<vmem>>, vector<1x64xf32>
      tpu.vector_store %arg10[%c0_51, %c0_52], %78 {strides = array<i32>} : memref<1x64xf32, #tpu.memory_space<vmem>>, vector<1x64xf32>,
    } else {
    }
    %c0 = arith.constant 0 : index
    %c0_1 = arith.constant 0 : index
    %3 = vector.load %arg1[%c0, %c0_1] : memref<16x16xf32, #tpu.memory_space<vmem>>, vector<16x16xf32>
    %c0_2 = arith.constant 0 : index
    %c0_3 = arith.constant 0 : index
    %4 = vector.load %arg2[%c0_2, %c0_3] : memref<16x132xf32, #tpu.memory_space<vmem>>, vector<16x132xf32>
    %cst = arith.constant dense<0.000000e+00> : vector<16x132xf32>
    %5 = tpu.matmul %3, %4, %cst {dimension_numbers = #tpu.dot_dimension_numbers<[1], [0], [0], [1], [0, 0, 1, 1], [], []>} : vector<16x16xf32>, vector<16x132xf32>, vector<16x132xf32> -> vector<16x132xf32>
    %6 = vector.extract_strided_slice %5 {offsets = [0, 0], sizes = [16, 128], strides = [1, 1]} : vector<16x132xf32> to vector<16x128xf32>
    %7 = vector.extract_strided_slice %5 {offsets = [0, 128], sizes = [16, 4], strides = [1, 1]} : vector<16x132xf32> to vector<16x4xf32>
    %c0_4 = arith.constant 0 : index
    %c0_5 = arith.constant 0 : index
    %8 = vector.load %arg3[%c0_4, %c0_5] : memref<1x4xf32, #tpu.memory_space<vmem>>, vector<1x4xf32>
    %9 = vector.broadcast %8 : vector<1x4xf32> to vector<16x4xf32>
    %10 = arith.addf %7, %9 : vector<16x4xf32>
    %cst_6 = arith.constant 0.000000e+00 : f32
    %11 = vector.broadcast %cst_6 : f32 to vector<16x4xf32>
    %12 = arith.cmpf oge, %10, %11 : vector<16x4xf32>
    %cst_7 = arith.constant 2.000000e-01 : f32
    %13 = vector.broadcast %cst_7 : f32 to vector<16x4xf32>
    %14 = arith.mulf %13, %10 : vector<16x4xf32>
    %15 = arith.select %12, %10, %14 : vector<16x4xi1>, vector<16x4xf32>
    %c16_i32 = arith.constant 16 : i32
    %16 = arith.muli %arg0, %c16_i32 : i32
    %17 = tpu.iota {dimensions = array<i32: 0>} : vector<16x1xi32>
    %18 = vector.broadcast %16 : i32 to vector<16x1xi32>
    %19 = arith.addi %18, %17 : vector<16x1xi32>
    %c24_i32 = arith.constant 24 : i32
    %20 = vector.broadcast %c24_i32 : i32 to vector<16x1xi32>
    %21 = arith.cmpi slt, %19, %20 : vector<16x1xi32>
    %cst_8 = arith.constant 0xFF800000 : f32
    %22 = vector.shape_cast %21 : vector<16x1xi1> to vector<16x1xi1>
    %23 = vector.broadcast %22 : vector<16x1xi1> to vector<16x4xi1>
    %24 = vector.broadcast %cst_8 : f32 to vector<16x4xf32>
    %25 = arith.select %23, %15, %24 : vector<16x4xi1>, vector<16x4xf32>
    %c0_9 = arith.constant 0 : index
    %c0_10 = arith.constant 0 : index
    %26 = vector.load %arg7[%c0_9, %c0_10] : memref<1x4xf32, #tpu.memory_space<vmem>>, vector<1x4xf32>
    %cst_11 = arith.constant dense<0xFF800000> : vector<4xf32>
    %27 = vector.multi_reduction <maximumf>, %25, %cst_11 [0] : vector<16x4xf32> to vector<4xf32>
    %28 = vector.shape_cast %27 : vector<4xf32> to vector<1x4xf32>
    %29 = arith.maximumf %26, %28 : vector<1x4xf32>
    %30 = arith.subf %26, %29 : vector<1x4xf32>
    %31 = math.exp %30 : vector<1x4xf32>
    %32 = vector.broadcast %29 : vector<1x4xf32> to vector<16x4xf32>
    %33 = arith.subf %25, %32 : vector<16x4xf32>
    %34 = math.exp %33 : vector<16x4xf32>
    %c0_12 = arith.constant 0 : index
    %c0_13 = arith.constant 0 : index
    %35 = vector.load %arg8[%c0_12, %c0_13] : memref<1x4xf32, #tpu.memory_space<vmem>>, vector<1x4xf32>
    %36 = arith.mulf %31, %35 : vector<1x4xf32>
    %cst_14 = arith.constant dense<0.000000e+00> : vector<4xf32>
    %37 = vector.multi_reduction <add>, %34, %cst_14 [0] : vector<16x4xf32> to vector<4xf32>
    %38 = vector.shape_cast %37 : vector<4xf32> to vector<1x4xf32>
    %39 = arith.addf %36, %38 : vector<1x4xf32>
    %c0_15 = arith.constant 0 : index
    %c0_16 = arith.constant 0 : index
    %40 = vector.load %arg8[%c0_15, %c0_16] : memref<1x4xf32, #tpu.memory_space<vmem>>, vector<1x4xf32>
    tpu.vector_store %arg8[%c0_15, %c0_16], %39 {strides = array<i32>} : memref<1x4xf32, #tpu.memory_space<vmem>>, vector<1x4xf32>,
    %c0_17 = arith.constant 0 : index
    %c0_18 = arith.constant 0 : index
    %41 = vector.load %arg7[%c0_17, %c0_18] : memref<1x4xf32, #tpu.memory_space<vmem>>, vector<1x4xf32>
    tpu.vector_store %arg7[%c0_17, %c0_18], %29 {strides = array<i32>} : memref<1x4xf32, #tpu.memory_space<vmem>>, vector<1x4xf32>,
    %c0_19 = arith.constant 0 : index
    %c0_20 = arith.constant 0 : index
    %42 = vector.load %arg4[%c0_19, %c0_20] : memref<4x128xf32, #tpu.memory_space<vmem>>, vector<4x128xf32>
    %cst_21 = arith.constant dense<0.000000e+00> : vector<16x128xf32>
    %43 = tpu.matmul %34, %42, %cst_21 {dimension_numbers = #tpu.dot_dimension_numbers<[1], [0], [0], [1], [0, 0, 1, 1], [], []>} : vector<16x4xf32>, vector<4x128xf32>, vector<16x128xf32> -> vector<16x128xf32>
    %44 = arith.mulf %43, %6 : vector<16x128xf32>
    %c0_22 = arith.constant 0 : index
    %c0_23 = arith.constant 0 : index
    %45 = vector.load %arg5[%c0_22, %c0_23] : memref<128x64xf32, #tpu.memory_space<vmem>>, vector<128x64xf32>
    %cst_24 = arith.constant dense<0.000000e+00> : vector<16x64xf32>
    %46 = tpu.matmul %44, %45, %cst_24 {dimension_numbers = #tpu.dot_dimension_numbers<[1], [0], [0], [1], [0, 0, 1, 1], [], []>} : vector<16x128xf32>, vector<128x64xf32>, vector<16x64xf32> -> vector<16x64xf32>
    %cst_25 = arith.constant 0x7F800000 : f32
    %47 = vector.shape_cast %21 : vector<16x1xi1> to vector<16x1xi1>
    %48 = vector.broadcast %47 : vector<16x1xi1> to vector<16x64xi1>
    %49 = vector.broadcast %cst_25 : f32 to vector<16x64xf32>
    %50 = arith.select %48, %46, %49 : vector<16x64xi1>, vector<16x64xf32>
    %cst_26 = arith.constant dense<0x7F800000> : vector<64xf32>
    %51 = vector.multi_reduction <minimumf>, %50, %cst_26 [0] : vector<16x64xf32> to vector<64xf32>
    %52 = vector.shape_cast %51 : vector<64xf32> to vector<1x64xf32>
    %cst_27 = arith.constant 0xFF800000 : f32
    %53 = vector.shape_cast %21 : vector<16x1xi1> to vector<16x1xi1>
    %54 = vector.broadcast %53 : vector<16x1xi1> to vector<16x64xi1>
    %55 = vector.broadcast %cst_27 : f32 to vector<16x64xf32>
    %56 = arith.select %54, %46, %55 : vector<16x64xi1>, vector<16x64xf32>
    %cst_28 = arith.constant dense<0xFF800000> : vector<64xf32>
    %57 = vector.multi_reduction <maximumf>, %56, %cst_28 [0] : vector<16x64xf32> to vector<64xf32>
    %58 = vector.shape_cast %57 : vector<64xf32> to vector<1x64xf32>
    %c0_29 = arith.constant 0 : index
    %c0_30 = arith.constant 0 : index
    %59 = vector.load %arg6[%c0_29, %c0_30] : memref<4x64xf32, #tpu.memory_space<vmem>>, vector<4x64xf32>
    %cst_31 = arith.constant dense<0.000000e+00> : vector<1x64xf32>
    %60 = tpu.matmul %31, %59, %cst_31 {dimension_numbers = #tpu.dot_dimension_numbers<[1], [0], [0], [1], [0, 0, 1, 1], [], []>} : vector<1x4xf32>, vector<4x64xf32>, vector<1x64xf32> -> vector<1x64xf32>
    %c0_i32_32 = arith.constant 0 : i32
    %61 = arith.cmpi eq, %arg0, %c0_i32_32 : i32
    %c0_33 = arith.constant 0 : index
    %c0_34 = arith.constant 0 : index
    %62 = vector.load %arg9[%c0_33, %c0_34] : memref<1x64xf32, #tpu.memory_space<vmem>>, vector<1x64xf32>
    %63 = arith.mulf %60, %62 : vector<1x64xf32>
    %64 = arith.minimumf %63, %52 : vector<1x64xf32>
    %65 = arith.select %61, %52, %64 : vector<1x64xf32>
    %c0_35 = arith.constant 0 : index
    %c0_36 = arith.constant 0 : index
    %66 = vector.load %arg9[%c0_35, %c0_36] : memref<1x64xf32, #tpu.memory_space<vmem>>, vector<1x64xf32>
    tpu.vector_store %arg9[%c0_35, %c0_36], %65 {strides = array<i32>} : memref<1x64xf32, #tpu.memory_space<vmem>>, vector<1x64xf32>,
    %c0_37 = arith.constant 0 : index
    %c0_38 = arith.constant 0 : index
    %67 = vector.load %arg10[%c0_37, %c0_38] : memref<1x64xf32, #tpu.memory_space<vmem>>, vector<1x64xf32>
    %68 = arith.mulf %60, %67 : vector<1x64xf32>
    %69 = arith.maximumf %68, %58 : vector<1x64xf32>
    %70 = arith.select %61, %58, %69 : vector<1x64xf32>
    %c0_39 = arith.constant 0 : index
    %c0_40 = arith.constant 0 : index
    %71 = vector.load %arg10[%c0_39, %c0_40] : memref<1x64xf32, #tpu.memory_space<vmem>>, vector<1x64xf32>
    tpu.vector_store %arg10[%c0_39, %c0_40], %70 {strides = array<i32>} : memref<1x64xf32, #tpu.memory_space<vmem>>, vector<1x64xf32>,
    return
  }
  func.func @transform_0(%arg0: i32) -> (i32, i32) {
    %c0_i32 = arith.constant 0 : i32
    %c0_i32_0 = arith.constant 0 : i32
    return %arg0, %c0_i32 : i32, i32
  }
  func.func @transform_1(%arg0: i32) -> (i32, i32) {
    %c0_i32 = arith.constant 0 : i32
    %c0_i32_0 = arith.constant 0 : i32
    %c0_i32_1 = arith.constant 0 : i32
    return %c0_i32, %c0_i32_0 : i32, i32
  }
  func.func @transform_2(%arg0: i32) -> (i32, i32) {
    %c0_i32 = arith.constant 0 : i32
    %c0_i32_0 = arith.constant 0 : i32
    %c0_i32_1 = arith.constant 0 : i32
    return %c0_i32, %c0_i32_0 : i32, i32
  }
  func.func @transform_3(%arg0: i32) -> (i32, i32) {
    %c0_i32 = arith.constant 0 : i32
    %c0_i32_0 = arith.constant 0 : i32
    %c0_i32_1 = arith.constant 0 : i32
    return %c0_i32, %c0_i32_0 : i32, i32
  }
  func.func @transform_4(%arg0: i32) -> (i32, i32) {
    %c0_i32 = arith.constant 0 : i32
    %c0_i32_0 = arith.constant 0 : i32
    %c0_i32_1 = arith.constant 0 : i32
    return %c0_i32, %c0_i32_0 : i32, i32
  }
  func.func @transform_5(%arg0: i32) -> (i32, i32) {
    %c0_i32 = arith.constant 0 : i32
    %c0_i32_0 = arith.constant 0 : i32
    %c0_i32_1 = arith.constant 0 : i32
    return %c0_i32, %c0_i32_0 : i32, i32
  }
  func.func @transform_6(%arg0: i32) -> (i32, i32) {
    %c0_i32 = arith.constant 0 : i32
    %c0_i32_0 = arith.constant 0 : i32
    %c0_i32_1 = arith.constant 0 : i32
    return %c0_i32, %c0_i32_0 : i32, i32
  }
  func.func @transform_7(%arg0: i32) -> (i32, i32) {
    %c0_i32 = arith.constant 0 : i32
    %c0_i32_0 = arith.constant 0 : i32
    %c0_i32_1 = arith.constant 0 : i32
    return %c0_i32, %c0_i32_0 : i32, i32
  }
  func.func @transform_8(%arg0: i32) -> (i32, i32) {
    %c0_i32 = arith.constant 0 : i32
    %c0_i32_0 = arith.constant 0 : i32
    %c0_i32_1 = arith.constant 0 : i32
    return %c0_i32, %c0_i32_0 : i32, i32
  }
  func.func @transform_9(%arg0: i32) -> (i32, i32) {
    %c0_i32 = arith.constant 0 : i32
    %c0_i32_0 = arith.constant 0 : i32
    %c0_i32_1 = arith.constant 0 : i32
    return %c0_i32, %c0_i32_0 : i32, i32
  }
}

</mosaic_0001>

<bundles_post_ra>
// kernel: tpu_custom_call.1
= control target key start
LH: loop header
LB: loop body
LE: loop exit
PB: predicated region body
PF: predicated region fallthrough
CT: control target
= control target key end

     0   :  { %15 = vsyncpa [#allocation3], 0  ;;  %s1143_s0 = inlined_call_operand.vmem [shape: f32[32,16], index: 0, kind: input, shape index: {}]   ;;  %s1144_s1 = inlined_call_operand.vmem [shape: f32[16,132], index: 1, kind: input, shape index: {}]   ;;  %s1145_s2 = inlined_call_operand.vmem [shape: f32[1,4], index: 2, kind: input, shape index: {}]   ;;  %s1146_s3 = inlined_call_operand.vmem [shape: f32[4,128], index: 3, kind: input, shape index: {}]   ;;  %s1147_s4 = inlined_call_operand.vmem [shape: f32[128,64], index: 4, kind: input, shape index: {}]   ;;  %s1148_s5 = inlined_call_operand.vmem [shape: f32[4,64], index: 5, kind: input, shape index: {}]   ;;  %s1149_s6 = inlined_call_operand.hbm [shape: f32[1,4], index: 6, kind: output, shape index: {0}]   ;;  %s1150_s7 = inlined_call_operand.hbm [shape: f32[1,4], index: 7, kind: output, shape index: {1}]   ;;  %s1151_s8 = inlined_call_operand.hbm [shape: f32[1,64], index: 8, kind: output, shape index: {2}]   ;;  %s1152_s9 = inlined_call_operand.hbm [shape: f32[1,64], index: 9, kind: output, shape index: {3}]  }
   0x1   :  { %16 = vsyncpa [#allocation5], 0 }
   0x2   :  { %17 = vsyncpa [#allocation8], 0  ;;  %s986_s30 = smov 0  }
   0x3 LB: > { %s992_s10 = sadd.s32 4294967295, %s927_s30   ;;  %p711_p0 = scmp.ge.s32.totalorder %s927_s30, 1  ;;  %s927_s30 = sphi %s986_s30, %s23_s30  }
   0x4   : > { %p278_p1 = scmp.lt.s32.totalorder %s927_s30, 3 }
   0x6   : > { %p279_p2 = pnand %p711_p0, %p278_p1 }
   0x7   : > { %s712_s11 = sshll.u32 (!%p279_p2), %s992_s10, 1  ;;  %p315_p3 = scmp.eq.s32.totalorder (!%p279_p2), %s992_s10, 0 }
   0x8   : > { %282 = sbr.rel (%p279_p2) target bundleno = 515 (0x203), region = 44  ;;  %p310_p4 = scmp.lt.s32.totalorder (!%p279_p2), %s712_s11, 3 }
   0x9   : > { %p714_p5 = scmp.ne.s32.totalorder (!%p279_p2), %s992_s10, 0 }
   0xd   : > { %s1154_s11 = smov (!%p310_p4, %s712_s11), 3  ;;  %318 = sbr.rel (%p714_p5) target bundleno = 23 (0x17), region = 48 }
   0xe   : > { %s713_s12 = sshll.u32 %s1154_s11, 3 }
   0xf   : > { %s313_s15 = scalar_lea.vmem %s1143_s0, %s713_s12 }
  0x12   : > { %vm319_vm0 = vcmask 24576   ;;  %vm322_vm1 = vcmask 516096   ;;  %v929_v0 = vmov -inf   ;;  %v930_v1 = vmov 0.0  }
  0x13   : > { %320 = vst.msk [vmem:[#allocation2] sm:$0x1] %vm319_vm0, %v929_v0  ;;  %v931_v2 = vmov inf  }
  0x14   : > { %321 = vst.msk [vmem:[#allocation4] sm:$0x1] %vm319_vm0, %v930_v1 }
  0x15   : > { %323 = vst.msk [vmem:[#allocation6] sm:$0x1] %vm322_vm1, %v931_v2 }
  0x16   : > { %324 = vst.msk [vmem:[#allocation7] sm:$0x1] %vm322_vm1, %v929_v0 }
  0x17 PF: > { %v329_v3 = vld [vmem:[%s1144_s1 + $0x10] sm:$0xff]  ;;  %v327_v4 = vld [vmem:[%s1144_s1] sm:$0xff]  ;;  %vm331_vm2 = vcmask 130048   ;;  %v330_v6 = vld [vmem:[%s1144_s1 + $0x18] sm:$0xff]  ;;  %v397_v12 = vlaneseq  ;;  %s719_s26 = sshll.u32 %s992_s10, 4  ;;  %vm412_vm7 = vcmask 31744  }
  0x18   : > { %352 = vmatpush.msra.mxu1 %v329_v3  ;;  %v325_v5 = vld [vmem:[%s313_s15] sm:$0xff]  ;;  %v328_v7 = vld [vmem:[%s1144_s1 + $0x8] sm:$0xff]  ;;  %v400_v16 = vstv %s719_s26  ;;  %vm457_vm8 = vcmask 1043456   ;;  %v501_v40 = vld [vmem:[%s1147_s4 + $0x78] sm:$0xff]  ;;  %vm447_vm9 = vcmask 24576   ;;  %p767_p6 = scmp.eq.s32.totalorder %s992_s10, 1 }
  0x19   : > { %v326_v8 = vld [vmem:[%s313_s15 + $0x8] sm:$0xff]  ;;  %v790_v11 = vld [vmem:[%s1145_s2] ss:$0 sm:$0xff]  ;;  %v398_v15 = vshrl.u32 %v397_v12, 7  ;;  %v500_v41 = vld [vmem:[%s1147_s4 + $0x70] sm:$0xff]  ;;  %502 = vmatpush.msra.mxu0 %v501_v40  ;;  %735 = vmatpush.msra.mxu3 %v501_v40  ;;  %s932_s25 = smov [#allocation4]  }
  0x1a   : > { %353 = vmatpush.msra.mxu1 %v327_v4  ;;  %v450_v26 = vld [vmem:[%s1146_s3] sm:$0xf]  ;;  %v499_v43 = vld [vmem:[%s1147_s4 + $0x68] sm:$0xff]  ;;  %v497_v48 = vld [vmem:[%s1147_s4 + $0x58] sm:$0xff]  ;;  %s607_s26 = sshll.u32 %s932_s25, 4  ;;  %s609_s29 = sshll.u32 %s1150_s7, 4  ;;  %s608_s26 = int_to_ptr.vmem [resolvable:$true] %s607_s26  ;;  %s610_s29 = int_to_ptr.hbm [resolvable:$true] %s609_s29 }
  0x1b   : > { %715 = vmatmul.msk.f32.vlgmr.msra.gmra.mxu1 %vm331_vm2, %v325_v5  ;;  %v399_v17 = vadd.s32 8, %v398_v15  ;;  %v1022_v19 = vadd.s32 %v400_v16, %v398_v15  ;;  %720 = vmatpush.msk.msra.mxu2 %vm457_vm8, %v450_v26  ;;  %v548_v34 = vld [vmem:[%s1148_s5] sm:$0xf]  ;;  %v496_v51 = vld [vmem:[%s1147_s4 + $0x50] sm:$0xff]  ;;  %v495_v52 = vld [vmem:[%s1147_s4 + $0x48] sm:$0xff]  ;;  %s597_s13 = sshll.u32 %s1149_s6, 4  ;;  %s598_s13 = int_to_ptr.hbm [resolvable:$true] %s597_s13 }
  0x1c   : > { %375 = vmatpush.msrb.mxu1 %v330_v6  ;;  %v411_v38 = vld [vmem:[#allocation2] sm:$0x1]  ;;  %503 = vmatpush.msra.mxu0 %v500_v41  ;;  %v493_v55 = vld [vmem:[%s1147_s4 + $0x38] sm:$0xff]  ;;  %v492_v58 = vld [vmem:[%s1147_s4 + $0x30] sm:$0xff]  ;;  %s933_s14 = smov [#allocation2]   ;;  %vm527_vm10 = vcmask 523264  }
  0x1d   : > { %v1024_v20 = vadd.s32 %v400_v16, %v399_v17  ;;  %vm403_vm4 = vcmp.lt.s32.totalorder %v1022_v19, 24  ;;  %723 = vmatpush.msk.msrb.mxu2 %vm457_vm8, %v548_v34  ;;  %736 = vmatpush.msra.mxu3 %v500_v41  ;;  %v498_v45 = vld [vmem:[%s1147_s4 + $0x60] sm:$0xff]  ;;  %v491_v62 = vld [vmem:[%s1147_s4 + $0x28] sm:$0xff]  ;;  %v489_v2 = vld [vmem:[%s1147_s4 + $0x18] sm:$0xff]  ;;  %s595_s15 = sshll.u32 %s933_s14, 4  ;;  %s934_s17 = smov [#allocation6]   ;;  %s596_s15 = int_to_ptr.vmem [resolvable:$true] %s595_s15 }
  0x1e   : > { %376 = vmatpush.msrb.mxu1 %v328_v7  ;;  %504 = vmatpush.msra.mxu0 %v499_v43  ;;  %v494_v53 = vld [vmem:[%s1147_s4 + $0x40] sm:$0xff]  ;;  %v488_v4 = vld [vmem:[%s1147_s4 + $0x10] sm:$0xff]  ;;  %v487_v15 = vld [vmem:[%s1147_s4 + $0x8] sm:$0xff]  ;;  %s578_s16 = scalar_select %p315_p3, 1, 0  ;;  %vm582_vm12 = vcmask 516096  }
  0x1f   : > { %vm404_vm6 = vcmp.lt.s32.totalorder %v1024_v20, 24  ;;  %737 = vmatpush.msra.mxu3 %v499_v43  ;;  %v490_v0 = vld [vmem:[%s1147_s4 + $0x20] sm:$0xff]  ;;  %s619_s18 = sshll.u32 %s934_s17, 4  ;;  %s621_s21 = sshll.u32 %s1151_s8, 4  ;;  %s620_s18 = int_to_ptr.vmem [resolvable:$true] %s619_s18  ;;  %s622_s21 = int_to_ptr.hbm [resolvable:$true] %s621_s21 }
  0x20   : > { %505 = vmatpush.msra.mxu0 %v498_v45  ;;  %v486_v16 = vld [vmem:[%s1147_s4] sm:$0xff]  ;;  %s935_s22 = smov [#allocation7]  }
  0x21   : > { %738 = vmatpush.msra.mxu3 %v498_v45  ;;  %v575_v41 = vld [vmem:[#allocation6] sm:$0x1]  ;;  %v584_v20 = vld [vmem:[#allocation7] sm:$0x1]  ;;  %s631_s23 = sshll.u32 %s935_s22, 4  ;;  %s632_s23 = int_to_ptr.vmem [resolvable:$true] %s631_s23 }
  0x22   : > { %506 = vmatpush.msra.mxu0 %v497_v48 }
  0x23   : > { %716 = vmatmul.msk.f32.gmra.mxu1 %vm331_vm2, %v326_v8  ;;  %739 = vmatpush.msra.mxu3 %v497_v48 }
  0x24   : > { %507 = vmatpush.msra.mxu0 %v496_v51 }
  0x25   : > { %740 = vmatpush.msra.mxu3 %v496_v51 }
  0x26   : > { %508 = vmatpush.msra.mxu0 %v495_v52 }
  0x27   : > { %741 = vmatpush.msra.mxu3 %v495_v52 }
  0x28   : > { %509 = vmatpush.msra.mxu0 %v494_v53 }
  0x29   : > { %742 = vmatpush.msra.mxu3 %v494_v53 }
  0x2a   : > { %510 = vmatpush.msra.mxu0 %v493_v55 }
  0x2b   : > { %717 = vmatmul.msk.f32.vlgmr.msrb.gmra.mxu1 %vm331_vm2, %v325_v5  ;;  %743 = vmatpush.msra.mxu3 %v493_v55 }
  0x2c   : > { %511 = vmatpush.msra.mxu0 %v492_v58 }
  0x2d   : > { %744 = vmatpush.msra.mxu3 %v492_v58 }
  0x2e   : > { %512 = vmatpush.msra.mxu0 %v491_v62 }
  0x2f   : > { %745 = vmatpush.msra.mxu3 %v491_v62 }
  0x30   : > { %513 = vmatpush.msra.mxu0 %v490_v0 }
  0x31   : > { %746 = vmatpush.msra.mxu3 %v490_v0 }
  0x32   : > { %514 = vmatpush.msra.mxu0 %v489_v2 }
  0x33   : > { %718 = vmatmul.msk.f32.gmra.mxu1 %vm331_vm2, %v326_v8  ;;  %747 = vmatpush.msra.mxu3 %v489_v2  ;;  %v435_v8 = vld [vmem:[#allocation4] sm:$0x1] }
  0x34   : > { %515 = vmatpush.msra.mxu0 %v488_v4 }
  0x35   : > { %748 = vmatpush.msra.mxu3 %v488_v4 }
  0x36   : > { %516 = vmatpush.msra.mxu0 %v487_v15 }
  0x37   : > { %749 = vmatpush.msra.mxu3 %v487_v15 }
  0x38   : > { %517 = vmatpush.msra.mxu0 %v486_v16 }
  0x39   : > { %750 = vmatpush.msra.mxu3 %v486_v16 }
  0x98   : > { %v1014_v9 = vpop.f32.mrf.mxu1 }
  0xa0   : > { %v1016_v10 = vpop.f32.mrf.mxu1 }
  0xa8   : > { %v378_v13 = vpop.f32.mrf.mxu1 }
  0xa9   : > { %v388_v14 = vadd.f32 %v790_v11, %v378_v13 }
  0xab   : > { %v392_v18 = vmul.f32 0.2, %v388_v14  ;;  %vm390_vm3 = vcmp.ge.f32.partialorder %v388_v14, 0.0 }
  0xad   : > { %v394_v22 = vsel %vm390_vm3, %v388_v14, %v392_v18 }
  0xae   : > { %v409_v25 = vsel %vm403_vm4, %v394_v22, -inf }
  0xaf   : > { %v413_v29 = vsel %vm412_vm7, %v409_v25, -inf }
  0xb0   : > { %v381_v21 = vpop.f32.mrf.mxu1 }
  0xb1   : > { %v389_v23 = vadd.f32 %v790_v11, %v381_v21 }
  0xb3   : > { %vm391_vm5 = vcmp.ge.f32.partialorder %v389_v23, 0.0  ;;  %v393_v24 = vmul.f32 0.2, %v389_v23 }
  0xb5   : > { %v395_v27 = vsel %vm391_vm5, %v389_v23, %v393_v24 }
  0xb6   : > { %v410_v28 = vsel %vm404_vm6, %v395_v27, -inf }
  0xb7   : > { %v414_v30 = vsel %vm412_vm7, %v410_v28, -inf }
  0xb8   : > { %v415_v31 = vmax.f32 %v413_v29, %v414_v30 }
  0xba   : > { %v416_v32 = vrot.slane %v415_v31, 4 }
  0xbc   : > { %v417_v33 = vmax.f32 %v415_v31, %v416_v32 }
  0xbe   : > { %v418_v35 = vrot.slane %v417_v33, 2 }
  0xc0   : > { %v419_v36 = vmax.f32 %v417_v33, %v418_v35 }
  0xc2   : > { %v420_v37 = vrot.slane %v419_v36, 1 }
  0xc4   : > { %v421_v39 = vmax.f32 %v419_v36, %v420_v37 }
  0xc6   : > { %v422_v42 = vmax.f32 %v411_v38, %v421_v39 }
  0xc8   : > { %v427_v44 = vperm.slane %v422_v42, 0  ;;  %449 = vst.msk [vmem:[#allocation2] sm:$0x1] %vm447_vm9, %v422_v42  ;;  %v423_v54 = vsub.f32 %v411_v38, %v422_v42 }
  0xc9   : > { %752 = dma.vmem_to_hbm [thread:$0]  (%p767_p6), %s596_s15, 16, %s598_s13, [#allocation3]  }
  0xca   : > { %v429_v46 = vsub.f32 %v409_v25, %v427_v44  ;;  %v430_v47 = vsub.f32 %v410_v28, %v427_v44  ;;  %v424_v60 = vmul.f32 1.442695, %v423_v54  ;;  %v579_v44 = vstv %s578_s16 }
  0xcb   : > { %vm580_vm11 = vcmp.eq.s32.totalorder %v579_v44, 1 }
  0xcc   : > { %v431_v49 = vmul.f32 1.442695, %v429_v46  ;;  %v433_v50 = vmul.f32 1.442695, %v430_v47 }
  0xce   : > { %791 = vpow2.f32 %v431_v49 }
  0xcf   : > { %793 = vpow2.f32 %v433_v50 }
  0xd0   : > { %795 = vpow2.f32 %v424_v60 }
  0xd4   : > { %v792_v56 = vpop.eup %791 }
  0xd5   : > { %v794_v57 = vpop.eup %793  ;;  %721 = vmatmul.msk.f32.vlgmr.msra.gmra.mxu2 %vm412_vm7, %v792_v56  ;;  %v437_v59 = vsel %vm412_vm7, %v792_v56, 0.0 }
  0xd6   : > { %v438_v61 = vsel %vm412_vm7, %v794_v57, 0.0  ;;  %v796_v7 = vpop.eup %795 }
  0xd7   : > { %v439_v63 = vadd.f32 %v438_v61, %v437_v59  ;;  %v436_v12 = vmul.f32 %v796_v7, %v435_v8 }
  0xd9   : > { %v440_v1 = vrot.slane %v439_v63, 4 }
  0xdb   : > { %v441_v3 = vadd.f32 %v440_v1, %v439_v63 }
  0xdd   : > { %722 = vmatmul.msk.f32.gmra.mxu2 %vm412_vm7, %v794_v57  ;;  %v442_v5 = vrot.slane %v441_v3, 2 }
  0xdf   : > { %v443_v6 = vadd.f32 %v442_v5, %v441_v3 }
  0xe1   : > { %v444_v11 = vrot.slane %v443_v6, 1 }
  0xe3   : > { %v445_v13 = vadd.f32 %v444_v11, %v443_v6 }
  0xe5   : > { %724 = vmatmul.msk.f32.vlgmr.msrb.gmra.mxu2 %vm412_vm7, %v796_v7  ;;  %v446_v14 = vadd.f32 %v445_v13, %v436_v12 }
  0xe7   : > { %448 = vst.msk [vmem:[#allocation4] sm:$0x1] %vm447_vm9, %v446_v14 }
  0xe8   : > { %754 = dma.vmem_to_hbm [thread:$0]  (%p767_p6), %s608_s26, 16, %s610_s29, [#allocation5]  }
  0xe9   : > { %s633_s26 = sshll.u32 %s1152_s9, 4  ;;  %s634_s26 = int_to_ptr.hbm [resolvable:$true] %s633_s26 }
 0x158   : > { %v478_v17 = vpop.f32.mrf.mxu2 }
 0x159   : > { %v484_v18 = vmul.f32 %v478_v17, %v1014_v9 }
 0x15b   : > { %518 = vmatmul.f32.vlgmr.msra.gmra.mxu0 %v484_v18 }
 0x160   : > { %v481_v21 = vpop.f32.mrf.mxu2 }
 0x161   : > { %v485_v22 = vmul.f32 %v481_v21, %v1016_v10 }
 0x163   : > { %521 = vmatmul.f32.vlgmr.msra.gmra.mxu3 %v485_v22 }
 0x168   : > { %v572_v40 = vpop.f32.mrf.mxu2 }
 0x169   : > { %v576_v45 = vmul.f32 %v575_v41, %v572_v40  ;;  %v585_v46 = vmul.f32 %v584_v20, %v572_v40 }
 0x1d8   : > { %v519_v9 = vpop.f32.mrf.mxu0 }
 0x1d9   : > { %v525_v10 = vsel %vm403_vm4, %v519_v9, inf  ;;  %v537_v23 = vsel %vm403_vm4, %v519_v9, -inf }
 0x1da   : > { %v528_v27 = vsel %vm527_vm10, %v525_v10, inf  ;;  %v539_v28 = vsel %vm527_vm10, %v537_v23, -inf }
 0x1e6   : > { %v522_v24 = vpop.f32.mrf.mxu3 }
 0x1e7   : > { %v526_v25 = vsel %vm404_vm6, %v522_v24, inf  ;;  %v538_v26 = vsel %vm404_vm6, %v522_v24, -inf }
 0x1e8   : > { %v529_v29 = vsel %vm527_vm10, %v526_v25, inf  ;;  %v540_v30 = vsel %vm527_vm10, %v538_v26, -inf }
 0x1e9   : > { %v530_v31 = vmin.f32 %v528_v27, %v529_v29  ;;  %v541_v32 = vmax.f32 %v539_v28, %v540_v30 }
 0x1eb   : > { %v531_v33 = vrot.slane %v530_v31, 4  ;;  %v542_v34 = vrot.slane %v541_v32, 4 }
 0x1ed   : > { %v532_v35 = vmin.f32 %v530_v31, %v531_v33  ;;  %v543_v36 = vmax.f32 %v541_v32, %v542_v34 }
 0x1ef   : > { %v533_v19 = vrot.slane %v532_v35, 2  ;;  %v544_v37 = vrot.slane %v543_v36, 2 }
 0x1f1   : > { %v534_v38 = vmin.f32 %v532_v35, %v533_v19  ;;  %v545_v39 = vmax.f32 %v543_v36, %v544_v37 }
 0x1f3   : > { %v535_v42 = vrot.slane %v534_v38, 1  ;;  %v546_v43 = vrot.slane %v545_v39, 1 }
 0x1f5   : > { %v536_v47 = vmin.f32 %v534_v38, %v535_v42  ;;  %v547_v48 = vmax.f32 %v545_v39, %v546_v43 }
 0x1f7   : > { %v577_v49 = vmin.f32 %v576_v45, %v536_v47  ;;  %v586_v50 = vmax.f32 %v585_v46, %v547_v48 }
 0x1f9   : > { %v581_v51 = vsel %vm580_vm11, %v536_v47, %v577_v49  ;;  %v587_v52 = vsel %vm580_vm11, %v547_v48, %v586_v50 }
 0x1fa   : > { %583 = vst.msk [vmem:[#allocation6] sm:$0x1] %vm582_vm12, %v581_v51 }
 0x1fb   : > { %756 = dma.vmem_to_hbm [thread:$0]  (%p767_p6), %s620_s18, 16, %s622_s21, [#allocation5]   ;;  %588 = vst.msk [vmem:[#allocation7] sm:$0x1] %vm582_vm12, %v587_v52 }
 0x1fc   : > { %758 = dma.vmem_to_hbm [thread:$0]  (%p767_p6), %s632_s23, 16, %s634_s26, [#allocation8]  }
 0x1fd   : > { %914 = dma.done.wait (%p767_p6), [#allocation3], 16  }
 0x1fe   : > { %916 = vsyncadd (%p767_p6), [#allocation3], 4294967280 }
 0x1ff   : > { %918 = dma.done.wait (%p767_p6), [#allocation5], 32  }
 0x200   : > { %920 = vsyncadd (%p767_p6), [#allocation5], 4294967264 }
 0x201   : > { %922 = dma.done.wait (%p767_p6), [#allocation8], 16  }
 0x202   : > { %924 = vsyncadd (%p767_p6), [#allocation8], 4294967280 }
 0x203 PF: > { %s23_s30 = sadd.s32 1, %s927_s30  }
 0x204   : > { %p20_p7 = scmp.ge.s32.totalorder %s23_s30, 4  }
 0x206   :  { %22 = sbr.rel (!%p20_p7) target bundleno = 3 (0x3), region = 99 }
 0x20b   :  { %662 = vsyncpa [#allocation3], 1 }
 0x20c   :  { %664 = vsyncpa [#allocation3 + $0x1], 1 }
 0x20d   :  { %665 = vsyncpa [#allocation5], 1 }
 0x20e   :  { %666 = vsyncpa [#allocation8], 1 }

</bundles_post_ra>
